<compile_context>
chip_gen: v7x
topology: tpu7x:2x2x1
jax: 0.10.0
libtpu: 0.0.40
codegen_flags: <defaults>
</compile_context>

<pallas_src>
import jax
import jax.numpy as jnp
from jax.experimental import pallas as pl
from jax.experimental.pallas import tpu as pltpu

KSIZE = 7
PAD = (KSIZE - 1) // 2
BN_EPS = 1e-5


def _cbam_kernel(x_ref, w1_ref, b1_ref, w2_ref, b2_ref, kmat_ref, bnb_ref, o_ref):
    Bt = x_ref.shape[0]
    x = x_ref[...].astype(jnp.float32)                        # (Bt, C, HW)

    # ---------------- Channel gate ----------------
    avg_pool = jnp.mean(x, axis=2)                            # (Bt, C)
    max_pool = jnp.max(x, axis=2)                             # (Bt, C)
    pools = jnp.concatenate([avg_pool, max_pool], axis=0)     # (2*Bt, C)

    # Stacked 2-layer MLP on the MXU (shared weights; both pools in one pass).
    h = jnp.dot(pools, w1_ref[...], preferred_element_type=jnp.float32) + b1_ref[...]
    h = jnp.maximum(h, 0.0)                                   # (2*Bt, Cr)
    att = jnp.dot(h, w2_ref[...], preferred_element_type=jnp.float32) + b2_ref[...]
    ch_att = att[:Bt] + att[Bt:]                              # (Bt, C) = mlp(avg)+mlp(max)
    ch_scale = jax.nn.sigmoid(ch_att)
    x_cg = x * ch_scale[:, :, None]                           # (Bt, C, HW)

    # ---------------- Spatial gate ----------------
    cmax = jnp.max(x_cg, axis=1)                              # (Bt, HW)
    cmean = jnp.mean(x_cg, axis=1)                            # (Bt, HW)
    # 7x7 conv + eval-mode BN: conv weights & BN scale folded into kmat,
    # BN bias folded into the SMEM scalar bnb.
    conv = (jnp.dot(cmax, kmat_ref[0], preferred_element_type=jnp.float32)
            + jnp.dot(cmean, kmat_ref[1], preferred_element_type=jnp.float32)
            + bnb_ref[0])                                     # (Bt, HW)
    sp_scale = jax.nn.sigmoid(conv)

    o_ref[...] = (x_cg * sp_scale[:, None, :]).astype(o_ref.dtype)


def _build_conv_matrix(w_sp, H, W):
    """(1,2,7,7) conv weights -> (2, H*W, H*W) matrix K so that
    conv2d(pooled, w_sp, pad=3)[b, 0].reshape(HW) ==
        pooled[b, 0].reshape(HW) @ K[0] + pooled[b, 1].reshape(HW) @ K[1]."""
    # TODO(synk): for large H*W switch to the banded per-row formulation
    # (14 small (H, W+6) @ (W+6, W) matmuls) -- this dense matrix is (H*W)^2.
    qy = jnp.arange(H).reshape(H, 1, 1, 1)
    qx = jnp.arange(W).reshape(1, W, 1, 1)
    py = jnp.arange(H).reshape(1, 1, H, 1)
    px = jnp.arange(W).reshape(1, 1, 1, W)
    ky = qy - py + PAD                                        # (H, 1, H, 1)
    kx = qx - px + PAD                                        # (1, W, 1, W)
    valid = (ky >= 0) & (ky < KSIZE) & (kx >= 0) & (kx < KSIZE)   # (H, W, H, W)
    kyc = jnp.clip(ky, 0, KSIZE - 1)
    kxc = jnp.clip(kx, 0, KSIZE - 1)
    vals = w_sp[0][:, kyc, kxc]                               # (2, H, W, H, W)
    kmat = jnp.where(valid[None], vals, 0.0)
    return kmat.reshape(2, H * W, H * W)


def _pick_batch_tile(n, max_bt=8):
    bt = min(n, max_bt)
    while n % bt:
        bt -= 1
    return bt


def cbam_pallas(x, w1, b1, w2, b2, w_sp, bn, *, max_batch_tile=8):
    """x: (N, C, H, W); params in native PyTorch layouts (see init_params)."""
    N, C, H, W = x.shape
    HW = H * W
    Cr = w1.shape[0]
    Bt = _pick_batch_tile(N, max_batch_tile)

    # Fold eval-mode BatchNorm2d(1) into the conv matrix + one scalar bias.
    # TODO(synk): train-mode (batch-statistics) BatchNorm is not implemented.
    gamma, beta, mu, var = bn[0], bn[1], bn[2], bn[3]
    bn_scale = gamma * jax.lax.rsqrt(var + BN_EPS)
    bn_bias = jnp.reshape(beta - mu * bn_scale, (1,)).astype(jnp.float32)
    kmat = (_build_conv_matrix(w_sp.astype(jnp.float32), H, W)
            * bn_scale).astype(jnp.float32)

    x_flat = x.reshape(N, C, HW)                              # lane-dense last dim

    grid_spec = pltpu.PrefetchScalarGridSpec(
        num_scalar_prefetch=0,
        grid=(N // Bt,),
        in_specs=[
            pl.BlockSpec((Bt, C, HW), lambda n: (n, 0, 0)),
            pl.BlockSpec((C, Cr), lambda n: (0, 0)),
            pl.BlockSpec((1, Cr), lambda n: (0, 0)),
            pl.BlockSpec((Cr, C), lambda n: (0, 0)),
            pl.BlockSpec((1, C), lambda n: (0, 0)),
            pl.BlockSpec((2, HW, HW), lambda n: (0, 0, 0)),
            pl.BlockSpec(memory_space=pltpu.MemorySpace.SMEM),
        ],
        out_specs=pl.BlockSpec((Bt, C, HW), lambda n: (n, 0, 0)),
    )
    out_flat = pl.pallas_call(
        _cbam_kernel,
        out_shape=jax.ShapeDtypeStruct((N, C, HW), x.dtype),
        grid_spec=grid_spec,
        compiler_params=pltpu.CompilerParams(
            dimension_semantics=("parallel",),
            vmem_limit_bytes=32 * 1024 * 1024,
        ),
    )(
        x_flat,
        jnp.transpose(w1).astype(jnp.float32),                # (C, Cr)
        b1.reshape(1, Cr).astype(jnp.float32),                # (1, Cr)
        jnp.transpose(w2).astype(jnp.float32),                # (Cr, C)
        b2.reshape(1, C).astype(jnp.float32),                 # (1, C)
        kmat,                                                 # (2, HW, HW)
        bn_bias,                                              # (1,) SMEM scalar
    )
    return out_flat.reshape(N, C, H, W)


def init_params(key, C, reduction=16):
    Cr = C // reduction
    k1, k2, k3, k4, k5 = jax.random.split(key, 5)
    # torch nn.Linear(C, Cr): weight (Cr, C), bias (Cr,)
    w1 = jax.random.normal(k1, (Cr, C), jnp.float32) * 0.1
    b1 = jax.random.normal(k2, (Cr,), jnp.float32) * 0.1
    # torch nn.Linear(Cr, C): weight (C, Cr), bias (C,)
    w2 = jax.random.normal(k3, (C, Cr), jnp.float32) * 0.1
    b2 = jax.random.normal(k4, (C,), jnp.float32) * 0.1
    # torch nn.Conv2d(2, 1, 7, padding=3, bias=False): weight (1, 2, 7, 7)
    w_sp = jax.random.normal(k5, (1, 2, KSIZE, KSIZE), jnp.float32) * 0.1
    # BatchNorm2d(1) defaults: gamma=1, beta=0, running_mean=0, running_var=1
    bn = jnp.array([1.0, 0.0, 0.0, 1.0], jnp.float32)
    return w1, b1, w2, b2, w_sp, bn


def cbam_ref(x, w1, b1, w2, b2, w_sp, bn):
    """Pure-JAX reference mirroring the PyTorch module (eval-mode BN)."""
    def mlp(p):                               # (N, C)
        h = jnp.maximum(p @ w1.T + b1, 0.0)
        return h @ w2.T + b2
    avg = jnp.mean(x, axis=(2, 3))
    mx = jnp.max(x, axis=(2, 3))
    ch_scale = jax.nn.sigmoid(mlp(avg) + mlp(mx))[:, :, None, None]
    x_cg = x * ch_scale
    pooled = jnp.concatenate(
        [jnp.max(x_cg, axis=1, keepdims=True),
         jnp.mean(x_cg, axis=1, keepdims=True)], axis=1)
    conv = jax.lax.conv_general_dilated(
        pooled, w_sp, window_strides=(1, 1), padding=((PAD, PAD), (PAD, PAD)),
        dimension_numbers=("NCHW", "OIHW", "NCHW"))
    gamma, beta, mu, var = bn
    conv = (conv - mu) * gamma * jax.lax.rsqrt(var + BN_EPS) + beta
    return x_cg * jax.nn.sigmoid(conv)


if __name__ == "__main__":
    key = jax.random.PRNGKey(0)
    kx_, kp = jax.random.split(key)
    N, C, H, W = 2, 32, 16, 16          # gate_channels=32, reduction_ratio=16
    x = jax.random.normal(kx_, (N, C, H, W), jnp.float32)
    w1, b1, w2, b2, w_sp, bn = init_params(kp, C, reduction=16)

    out = cbam_pallas(x, w1, b1, w2, b2, w_sp, bn)
    out = jax.block_until_ready(out)

    ref = cbam_ref(x, w1, b1, w2, b2, w_sp, bn)
    assert out.shape == x.shape
    err = float(jnp.max(jnp.abs(out - ref)))
    assert jnp.allclose(out, ref, atol=1e-3, rtol=1e-3), err
    print("KERNEL_OK")
</pallas_src>

<mosaic_0001>
module attributes {stable_mosaic.version = 11 : i64} {
  func.func @_cbam_kernel(%arg0: i32, %arg1: memref<2x32x256xf32, #tpu.memory_space<vmem>>, %arg2: memref<32x2xf32, #tpu.memory_space<vmem>>, %arg3: memref<1x2xf32, #tpu.memory_space<vmem>>, %arg4: memref<2x32xf32, #tpu.memory_space<vmem>>, %arg5: memref<1x32xf32, #tpu.memory_space<vmem>>, %arg6: memref<2x256x256xf32, #tpu.memory_space<vmem>>, %arg7: memref<1xf32, #tpu.memory_space<smem>>, %arg8: memref<2x32x256xf32, #tpu.memory_space<vmem>>) attributes {dimension_semantics = [#tpu.dimension_semantics<parallel>], iteration_bounds = array<i64: 1>, scalar_prefetch = 0 : i64, scratch_operands = 0 : i64, tpu.core_type = #tpu.core_type<tc>, window_params = [{transform_indices = @transform_0, window_bounds = array<i64: 2, 32, 256>}, {pipeline_mode = #tpu.pipeline_mode<synchronous>, transform_indices = @transform_1, window_bounds = array<i64: 32, 2>}, {pipeline_mode = #tpu.pipeline_mode<synchronous>, transform_indices = @transform_2, window_bounds = array<i64: 1, 2>}, {pipeline_mode = #tpu.pipeline_mode<synchronous>, transform_indices = @transform_3, window_bounds = array<i64: 2, 32>}, {pipeline_mode = #tpu.pipeline_mode<synchronous>, transform_indices = @transform_4, window_bounds = array<i64: 1, 32>}, {pipeline_mode = #tpu.pipeline_mode<synchronous>, transform_indices = @transform_5, window_bounds = array<i64: 2, 256, 256>}, {transform_indices = @transform_6, window_bounds = array<i64: 1>}, {transform_indices = @transform_7, window_bounds = array<i64: 2, 32, 256>}]} {
    %c0 = arith.constant 0 : index
    %c0_0 = arith.constant 0 : index
    %c0_1 = arith.constant 0 : index
    %0 = vector.load %arg1[%c0, %c0_0, %c0_1] : memref<2x32x256xf32, #tpu.memory_space<vmem>>, vector<2x32x256xf32>
    %cst = arith.constant dense<0.000000e+00> : vector<2x32xf32>
    %1 = vector.multi_reduction <add>, %0, %cst [2] : vector<2x32x256xf32> to vector<2x32xf32>
    %cst_2 = arith.constant 2.560000e+02 : f32
    %2 = vector.broadcast %cst_2 : f32 to vector<2x32xf32>
    %3 = arith.divf %1, %2 : vector<2x32xf32>
    %cst_3 = arith.constant dense<0xFF800000> : vector<2x32xf32>
    %4 = vector.multi_reduction <maximumf>, %0, %cst_3 [2] : vector<2x32x256xf32> to vector<2x32xf32>
    %5 = tpu.concatenate %3, %4 in 0 : vector<2x32xf32>, vector<2x32xf32> -> vector<4x32xf32>
    %c0_4 = arith.constant 0 : index
    %c0_5 = arith.constant 0 : index
    %6 = vector.load %arg2[%c0_4, %c0_5] : memref<32x2xf32, #tpu.memory_space<vmem>>, vector<32x2xf32>
    %cst_6 = arith.constant dense<0.000000e+00> : vector<4x2xf32>
    %7 = tpu.matmul %5, %6, %cst_6 {dimension_numbers = #tpu.dot_dimension_numbers<[1], [0], [0], [1], [0, 0, 1, 1], [], []>} : vector<4x32xf32>, vector<32x2xf32>, vector<4x2xf32> -> vector<4x2xf32>
    %c0_7 = arith.constant 0 : index
    %c0_8 = arith.constant 0 : index
    %8 = vector.load %arg3[%c0_7, %c0_8] : memref<1x2xf32, #tpu.memory_space<vmem>>, vector<1x2xf32>
    %9 = vector.broadcast %8 : vector<1x2xf32> to vector<4x2xf32>
    %10 = arith.addf %7, %9 : vector<4x2xf32>
    %cst_9 = arith.constant 0.000000e+00 : f32
    %11 = vector.broadcast %cst_9 : f32 to vector<4x2xf32>
    %12 = arith.maximumf %10, %11 : vector<4x2xf32>
    %c0_10 = arith.constant 0 : index
    %c0_11 = arith.constant 0 : index
    %13 = vector.load %arg4[%c0_10, %c0_11] : memref<2x32xf32, #tpu.memory_space<vmem>>, vector<2x32xf32>
    %cst_12 = arith.constant dense<0.000000e+00> : vector<4x32xf32>
    %14 = tpu.matmul %12, %13, %cst_12 {dimension_numbers = #tpu.dot_dimension_numbers<[1], [0], [0], [1], [0, 0, 1, 1], [], []>} : vector<4x2xf32>, vector<2x32xf32>, vector<4x32xf32> -> vector<4x32xf32>
    %c0_13 = arith.constant 0 : index
    %c0_14 = arith.constant 0 : index
    %15 = vector.load %arg5[%c0_13, %c0_14] : memref<1x32xf32, #tpu.memory_space<vmem>>, vector<1x32xf32>
    %16 = vector.broadcast %15 : vector<1x32xf32> to vector<4x32xf32>
    %17 = arith.addf %14, %16 : vector<4x32xf32>
    %18 = vector.extract_strided_slice %17 {offsets = [0, 0], sizes = [2, 32], strides = [1, 1]} : vector<4x32xf32> to vector<2x32xf32>
    %19 = vector.extract_strided_slice %17 {offsets = [2, 0], sizes = [2, 32], strides = [1, 1]} : vector<4x32xf32> to vector<2x32xf32>
    %20 = arith.addf %18, %19 : vector<2x32xf32>
    %21 = arith.negf %20 : vector<2x32xf32>
    %22 = math.exp %21 : vector<2x32xf32>
    %cst_15 = arith.constant 1.000000e+00 : f32
    %23 = vector.broadcast %cst_15 : f32 to vector<2x32xf32>
    %24 = arith.addf %23, %22 : vector<2x32xf32>
    %25 = arith.divf %23, %24 : vector<2x32xf32>
    %26 = vector.shape_cast %25 : vector<2x32xf32> to vector<2x32x1xf32>
    %27 = vector.broadcast %26 : vector<2x32x1xf32> to vector<2x32x256xf32>
    %28 = arith.mulf %0, %27 : vector<2x32x256xf32>
    %cst_16 = arith.constant dense<0xFF800000> : vector<2x256xf32>
    %29 = vector.multi_reduction <maximumf>, %28, %cst_16 [1] : vector<2x32x256xf32> to vector<2x256xf32>
    %cst_17 = arith.constant dense<0.000000e+00> : vector<2x256xf32>
    %30 = vector.multi_reduction <add>, %28, %cst_17 [1] : vector<2x32x256xf32> to vector<2x256xf32>
    %cst_18 = arith.constant 3.200000e+01 : f32
    %31 = vector.broadcast %cst_18 : f32 to vector<2x256xf32>
    %32 = arith.divf %30, %31 : vector<2x256xf32>
    %c0_19 = arith.constant 0 : index
    %c0_20 = arith.constant 0 : index
    %c0_21 = arith.constant 0 : index
    %33 = vector.load %arg6[%c0_19, %c0_20, %c0_21] : memref<2x256x256xf32, #tpu.memory_space<vmem>>, vector<1x256x256xf32>
    %34 = vector.shape_cast %33 : vector<1x256x256xf32> to vector<256x256xf32>
    %cst_22 = arith.constant dense<0.000000e+00> : vector<2x256xf32>
    %35 = tpu.matmul %29, %34, %cst_22 {dimension_numbers = #tpu.dot_dimension_numbers<[1], [0], [0], [1], [0, 0, 1, 1], [], []>} : vector<2x256xf32>, vector<256x256xf32>, vector<2x256xf32> -> vector<2x256xf32>
    %c1 = arith.constant 1 : index
    %c0_23 = arith.constant 0 : index
    %c0_24 = arith.constant 0 : index
    %36 = vector.load %arg6[%c1, %c0_23, %c0_24] : memref<2x256x256xf32, #tpu.memory_space<vmem>>, vector<1x256x256xf32>
    %37 = vector.shape_cast %36 : vector<1x256x256xf32> to vector<256x256xf32>
    %cst_25 = arith.constant dense<0.000000e+00> : vector<2x256xf32>
    %38 = tpu.matmul %32, %37, %cst_25 {dimension_numbers = #tpu.dot_dimension_numbers<[1], [0], [0], [1], [0, 0, 1, 1], [], []>} : vector<2x256xf32>, vector<256x256xf32>, vector<2x256xf32> -> vector<2x256xf32>
    %39 = arith.addf %35, %38 : vector<2x256xf32>
    %c0_26 = arith.constant 0 : index
    %40 = memref.load %arg7[%c0_26] : memref<1xf32, #tpu.memory_space<smem>>
    %41 = vector.broadcast %40 : f32 to vector<2x256xf32>
    %42 = arith.addf %39, %41 : vector<2x256xf32>
    %43 = arith.negf %42 : vector<2x256xf32>
    %44 = math.exp %43 : vector<2x256xf32>
    %cst_27 = arith.constant 1.000000e+00 : f32
    %45 = vector.broadcast %cst_27 : f32 to vector<2x256xf32>
    %46 = arith.addf %45, %44 : vector<2x256xf32>
    %47 = arith.divf %45, %46 : vector<2x256xf32>
    %48 = vector.shape_cast %47 : vector<2x256xf32> to vector<2x1x256xf32>
    %49 = vector.broadcast %48 : vector<2x1x256xf32> to vector<2x32x256xf32>
    %50 = arith.mulf %28, %49 : vector<2x32x256xf32>
    %c0_28 = arith.constant 0 : index
    %c0_29 = arith.constant 0 : index
    %c0_30 = arith.constant 0 : index
    %51 = vector.load %arg8[%c0_28, %c0_29, %c0_30] : memref<2x32x256xf32, #tpu.memory_space<vmem>>, vector<2x32x256xf32>
    tpu.vector_store %arg8[%c0_28, %c0_29, %c0_30], %50 {strides = array<i32>} : memref<2x32x256xf32, #tpu.memory_space<vmem>>, vector<2x32x256xf32>,
    return
  }
  func.func @transform_0(%arg0: i32) -> (i32, i32, i32) {
    %c0_i32 = arith.constant 0 : i32
    %c0_i32_0 = arith.constant 0 : i32
    %c0_i32_1 = arith.constant 0 : i32
    return %arg0, %c0_i32, %c0_i32_0 : i32, i32, i32
  }
  func.func @transform_1(%arg0: i32) -> (i32, i32) {
    %c0_i32 = arith.constant 0 : i32
    %c0_i32_0 = arith.constant 0 : i32
    %c0_i32_1 = arith.constant 0 : i32
    return %c0_i32, %c0_i32_0 : i32, i32
  }
  func.func @transform_2(%arg0: i32) -> (i32, i32) {
    %c0_i32 = arith.constant 0 : i32
    %c0_i32_0 = arith.constant 0 : i32
    %c0_i32_1 = arith.constant 0 : i32
    return %c0_i32, %c0_i32_0 : i32, i32
  }
  func.func @transform_3(%arg0: i32) -> (i32, i32) {
    %c0_i32 = arith.constant 0 : i32
    %c0_i32_0 = arith.constant 0 : i32
    %c0_i32_1 = arith.constant 0 : i32
    return %c0_i32, %c0_i32_0 : i32, i32
  }
  func.func @transform_4(%arg0: i32) -> (i32, i32) {
    %c0_i32 = arith.constant 0 : i32
    %c0_i32_0 = arith.constant 0 : i32
    %c0_i32_1 = arith.constant 0 : i32
    return %c0_i32, %c0_i32_0 : i32, i32
  }
  func.func @transform_5(%arg0: i32) -> (i32, i32, i32) {
    %c0_i32 = arith.constant 0 : i32
    %c0_i32_0 = arith.constant 0 : i32
    %c0_i32_1 = arith.constant 0 : i32
    %c0_i32_2 = arith.constant 0 : i32
    return %c0_i32, %c0_i32_0, %c0_i32_1 : i32, i32, i32
  }
  func.func @transform_6(%arg0: i32) -> i32 {
    %c0_i32 = arith.constant 0 : i32
    %c0_i32_0 = arith.constant 0 : i32
    return %c0_i32 : i32
  }
  func.func @transform_7(%arg0: i32) -> (i32, i32, i32) {
    %c0_i32 = arith.constant 0 : i32
    %c0_i32_0 = arith.constant 0 : i32
    %c0_i32_1 = arith.constant 0 : i32
    return %arg0, %c0_i32, %c0_i32_0 : i32, i32, i32
  }
}

</mosaic_0001>

<bundles_post_ra>
// kernel: tpu_custom_call.1
= control target key start
LH: loop header
LB: loop body
LE: loop exit
PB: predicated region body
PF: predicated region fallthrough
CT: control target
= control target key end

     0   :  { %13 = vsyncpa [#allocation4], 0  ;;  %s1528_s0 = inlined_call_operand.hbm [shape: f32[2,32,256], index: 0, kind: input, shape index: {}]   ;;  %s1529_s1 = inlined_call_operand.vmem [shape: f32[32,2], index: 1, kind: input, shape index: {}]   ;;  %s1530_s2 = inlined_call_operand.vmem [shape: f32[1,2], index: 2, kind: input, shape index: {}]   ;;  %s1531_s3 = inlined_call_operand.vmem [shape: f32[2,32], index: 3, kind: input, shape index: {}]   ;;  %s1532_s4 = inlined_call_operand.vmem [shape: f32[1,32], index: 4, kind: input, shape index: {}]   ;;  %s1533_s5 = inlined_call_operand.hbm [shape: f32[2,256,256], index: 5, kind: input, shape index: {}]   ;;  %s1534_s6 = inlined_call_operand.<no memory space> [shape: f32[1], index: 6, kind: input, shape index: {}]   ;;  %s1535_s7 = inlined_call_operand.hbm [shape: f32[2,32,256], index: 7, kind: output, shape index: {}]  }
   0x1   :  { %14 = vsyncpa [#allocation7], 0 }
   0x2   :  { %15 = vsyncpa [#allocation5], 0  ;;  %s1207_s24 = smov [#allocation3]   ;;  %s1135_s28 = scalar_lea.hbm %s1528_s0, 2048 }
   0x3   :  { %s21_s25 = sshll.u32 %s1207_s24, 4  ;;  %p1136_p0 = scmp.ne.s32.totalorder %s1528_s0, %s1135_s28  ;;  %s22_s25 = int_to_ptr.vmem [resolvable:$true] %s21_s25 }
   0x4   :  { %p1139_p1 = scmp.lt.u32.totalorder %s1135_s28, %s1528_s0 }
   0x6   :  { %p1141_p2 = pnand %p1139_p1, %p1136_p0 }
   0x8   :  { %1144 = shalt.err (!%p1141_p2)
}
   0x9   :  { %s1145_s10 = scalar_lea.vmem %s22_s25, 2048  ;;  %p1150_p4 = scmp.lt.s32.totalorder %s22_s25, %s22_s25 }
   0xa   :  { %p1146_p3 = scmp.ne.s32.totalorder %s22_s25, %s1145_s10  ;;  %p1151_p5 = scmp.lt.s32.totalorder %s1145_s10, %s1145_s10 }
   0xc   :  { %p1152_p6 = por %p1151_p5, %p1150_p4 }
   0xe   :  { %p1153_p7 = pnand %p1152_p6, %p1146_p3 }
  0x10   :  { %1156 = shalt.err (!%p1153_p7)
}
  0x11   :  { %s1208_s11 = smov 256   ;;  %s1209_s12 = smov 16  }
  0x12   :  { %27 = dma.hbm_to_vmem [thread:$0]  %s1528_s0, 2048, %s22_s25, [#allocation4], %s1208_s11, %s1208_s11, %s1209_s12  }
  0x13   :  { %s1210_s15 = smov [#allocation6]   ;;  %s1157_s19 = scalar_lea.hbm %s1533_s5, 16384 }
  0x14   :  { %s41_s16 = sshll.u32 %s1210_s15, 4  ;;  %p1158_p8 = scmp.ne.s32.totalorder %s1533_s5, %s1157_s19  ;;  %s42_s16 = int_to_ptr.vmem [resolvable:$true] %s41_s16 }
  0x15   :  { %p1161_p9 = scmp.lt.u32.totalorder %s1157_s19, %s1533_s5 }
  0x17   :  { %p1163_p10 = pnand %p1161_p9, %p1158_p8 }
  0x19   :  { %1166 = shalt.err (!%p1163_p10)
}
  0x1a   :  { %s1167_s24 = scalar_lea.vmem %s42_s16, 16384  ;;  %p1172_p12 = scmp.lt.s32.totalorder %s42_s16, %s42_s16 }
  0x1b   :  { %p1168_p11 = scmp.ne.s32.totalorder %s42_s16, %s1167_s24  ;;  %p1173_p13 = scmp.lt.s32.totalorder %s1167_s24, %s1167_s24 }
  0x1d   :  { %p1174_p0 = por %p1173_p13, %p1172_p12 }
  0x1f   :  { %p1175_p1 = pnand %p1174_p0, %p1168_p11 }
  0x21   :  { %1178 = shalt.err (!%p1175_p1)
}
  0x22   :  { %47 = dma.hbm_to_vmem [thread:$0]  %s1533_s5, 16384, %s42_s16, [#allocation7], %s1208_s11, %s1208_s11, %s1209_s12  }
  0x23   :  { %1201 = dma.done.wait [#allocation4], 2048  }
  0x24   :  { %1202 = vsyncadd [#allocation4], 4294965248 }
  0x25   :  { %1203 = dma.done.wait [#allocation7], 16384  }
  0x26   :  { %1204 = vsyncadd [#allocation7], 4294950912  ;;  %v1286_v0 = vld [vmem:[#allocation3 + $0x40] sm:$0xff]  ;;  %v1288_v1 = vld [vmem:[#allocation3 + $0x48] sm:$0xff]  ;;  %v1211_v35 = vmov 0.0|0.0   ;;  %vm1212_vm0 = vmmov 0   ;;  %v137_v45 = vlaneseq }
  0x27   :  { %v1290_v2 = vld [vmem:[#allocation3] sm:$0xff]  ;;  %v84_v3 = vadd.f32 %v1288_v1, %v1286_v0  ;;  %v1294_v4 = vld [vmem:[#allocation3 + $0x8] sm:$0xff]  ;;  %v1296_v5 = vld [vmem:[#allocation3 + $0x50] sm:$0xff]  ;;  %v117_v27 = vmax.f32 %v1286_v0, %v1288_v1  ;;  %978 = vmatprep.subr.bf16.mxu0 %v1211_v35  ;;  %v1213_v39 = vmov 0.0   ;;  %vm148_vm1 = vcmask 130112  }
  0x28   :  { %v1298_v6 = vld [vmem:[#allocation3 + $0x58] sm:$0xff]  ;;  %v72_v7 = vadd.f32 %v1294_v4, %v1290_v2  ;;  %v1302_v8 = vld [vmem:[#allocation3 + $0x10] sm:$0xff]  ;;  %v1310_v12 = vld [vmem:[#allocation3 + $0x60] sm:$0xff]  ;;  %v105_v25 = vmax.f32 %v1290_v2, %v1294_v4  ;;  %970 = vmatprep.mubr.msk.f32.mxu0 %vm1212_vm0, %v1213_v39  ;;  %973 = vmatprep.subr.mxu1 %v1213_v39  ;;  %v138_v48 = vand.u32 127, %v137_v45  ;;  %v1362_v50 = vshrl.u32 %v137_v45, 7 }
  0x29   :  { %v1304_v9 = vld [vmem:[#allocation3 + $0x18] sm:$0xff]  ;;  %85 = vadd.xlane.f32.xlu1 %v84_v3  ;;  %v87_v10 = vadd.f32 %v1298_v6, %v1296_v5  ;;  %v1312_v13 = vld [vmem:[#allocation3 + $0x68] sm:$0xff]  ;;  %v1314_v14 = vld [vmem:[#allocation3 + $0x20] sm:$0xff]  ;;  %v120_v26 = vmax.f32 %v1296_v5, %v1298_v6  ;;  %975 = vmatprep.mubr.msk.f32.mxu1 %vm1212_vm0, %v1213_v39  ;;  %vm155_vm2 = vcmask 195712   ;;  %vm162_vm3 = vcmask 261312  }
  0x2a   :  { %73 = vadd.xlane.f32.xlu0 %v72_v7  ;;  %v75_v11 = vadd.f32 %v1304_v9, %v1302_v8  ;;  %v1316_v15 = vld [vmem:[#allocation3 + $0x28] sm:$0xff]  ;;  %v90_v16 = vadd.f32 %v1312_v13, %v1310_v12  ;;  %v1322_v18 = vld [vmem:[#allocation3 + $0x70] sm:$0xff]  ;;  %v1324_v19 = vld [vmem:[#allocation3 + $0x78] sm:$0xff]  ;;  %v108_v24 = vmax.f32 %v1302_v8, %v1304_v9  ;;  %v123_v28 = vmax.f32 %v1310_v12, %v1312_v13 }
  0x2b   :  { %v78_v17 = vadd.f32 %v1316_v15, %v1314_v14  ;;  %v1326_v20 = vld [vmem:[#allocation3 + $0x30] sm:$0xff]  ;;  %v1328_v21 = vld [vmem:[#allocation3 + $0x38] sm:$0xff]  ;;  %v93_v22 = vadd.f32 %v1324_v19, %v1322_v18  ;;  %v111_v29 = vmax.f32 %v1314_v14, %v1316_v15  ;;  %v126_v30 = vmax.f32 %v1322_v18, %v1324_v19  ;;  %v237_v32 = vld [vmem:[%s1529_s1] sm:$0xff] }
  0x2c   :  { %v81_v23 = vadd.f32 %v1328_v21, %v1326_v20  ;;  %v114_v31 = vmax.f32 %v1326_v20, %v1328_v21  ;;  %v238_v33 = vld [vmem:[%s1529_s1 + $0x8] sm:$0xff]  ;;  %v239_v36 = vld [vmem:[%s1529_s1 + $0x10] sm:$0xff]  ;;  %v240_v37 = vld [vmem:[%s1529_s1 + $0x18] sm:$0xff]  ;;  %v143_v51 = vadd.s32 4294967288, %v138_v48  ;;  %v150_v52 = vadd.s32 4294967280, %v138_v48 }
  0x2d   :  { %88 = vadd.xlane.f32.xlu1 %v87_v10  ;;  %v979_v34 = vpack.c.bf16 %v238_v33, %v237_v32  ;;  %v982_v38 = vpack.c.bf16 %v240_v37, %v239_v36  ;;  %v157_v54 = vadd.s32 4294967272, %v138_v48  ;;  %v141_v56 = vsub.s32 %v138_v48, %v1362_v50 }
  0x2e   :  { %76 = vadd.xlane.f32.xlu0 %v75_v11  ;;  %v146_v57 = vsub.s32 %v143_v51, %v1362_v50  ;;  %v153_v59 = vsub.s32 %v150_v52, %v1362_v50  ;;  %vm183_vm4 = vcmask 1041409   ;;  %vm232_vm5 = vcmask 1043459  }
  0x2f   :  { %980 = vmatpush3.bf16.msra.mxu0 %v979_v34  ;;  %v160_v10 = vsub.s32 %v157_v54, %v1362_v50  ;;  %vm235_vm6 = vcmask 1041408   ;;  %vm248_vm7 = vcmask 261120   ;;  %vm331_vm8 = vcmask 15360  }
  0x30   :  { %981 = vmatprep.subr.bf16.mxu0 %v1211_v35 }
  0x31   :  { %91 = vadd.xlane.f32.xlu1 %v90_v16 }
  0x32   :  { %79 = vadd.xlane.f32.xlu0 %v78_v17 }
  0x33   :  { %983 = vmatpush3.bf16.msra.mxu0 %v982_v38 }
  0x35   :  { %94 = vadd.xlane.f32.xlu1 %v93_v22 }
  0x36   :  { %82 = vadd.xlane.f32.xlu0 %v81_v23 }
  0x39   :  { %109 = vmax.xlane.f32.xlu1 %v108_v24 }
  0x3a   :  { %106 = vmax.xlane.f32.xlu0 %v105_v25 }
  0x3d   :  { %121 = vmax.xlane.f32.xlu1 %v120_v26 }
  0x3e   :  { %118 = vmax.xlane.f32.xlu0 %v117_v27 }
  0x41   :  { %124 = vmax.xlane.f32.xlu1 %v123_v28 }
  0x42   :  { %112 = vmax.xlane.f32.xlu0 %v111_v29 }
  0x45   :  { %127 = vmax.xlane.f32.xlu1 %v126_v30 }
  0x46   :  { %115 = vmax.xlane.f32.xlu0 %v114_v31 }
  0xb6   :  { %v86_v40 = vpop.xlane.xlu1 %85 }
  0xb7   :  { %v74_v41 = vpop.xlane.xlu0 %73  ;;  %v101_v60 = vmul.f32 0.00390625, %v86_v40 }
  0xb8   :  { %v97_v61 = vmul.f32 0.00390625, %v74_v41 }
  0xb9   :  { %v167_v23 = vrot.slane %v101_v60, %v141_v56 }
  0xba   :  { %v89_v42 = vpop.xlane.xlu1 %88  ;;  %v142_v24 = vrot.slane %v97_v61, %v141_v56 }
  0xbb   :  { %v77_v43 = vpop.xlane.xlu0 %76  ;;  %v102_v58 = vmul.f32 0.00390625, %v89_v42 }
  0xbc   :  { %v98_v62 = vmul.f32 0.00390625, %v77_v43 }
  0xbd   :  { %v171_v22 = vrot.slane %v102_v58, %v146_v57  ;;  %v323_v58 = vld [vmem:[%s1531_s3] sm:$0x3] }
  0xbe   :  { %v92_v44 = vpop.xlane.xlu1 %91  ;;  %v147_v25 = vrot.slane %v98_v62, %v146_v57  ;;  %974 = vmatpush3.msk.msra.mxu1 %vm235_vm6, %v323_v58  ;;  %v627_v58 = vld [vmem:[#allocation6 + $0x268] sm:$0xff] }
  0xbf   :  { %v80_v46 = vpop.xlane.xlu0 %79  ;;  %v103_v63 = vmul.f32 0.00390625, %v92_v44  ;;  %v172_v37 = vsel %vm148_vm1, %v171_v22, %v167_v23  ;;  %v617_v22 = vld [vmem:[#allocation6 + $0x218] sm:$0xff] }
  0xc0   :  { %v99_v7 = vmul.f32 0.00390625, %v80_v46  ;;  %v149_v39 = vsel %vm148_vm1, %v147_v25, %v142_v24  ;;  %v614_v25 = vld [vmem:[#allocation6 + $0x200] sm:$0xff] }
  0xc1   :  { %v176_v26 = vrot.slane %v103_v63, %v153_v59 }
  0xc2   :  { %v95_v47 = vpop.xlane.xlu1 %94  ;;  %v154_v28 = vrot.slane %v99_v7, %v153_v59  ;;  %v552_v7 = vld [vmem:[#allocation6 + $0x18] sm:$0xff] }
  0xc3   :  { %v83_v49 = vpop.xlane.xlu0 %82  ;;  %v104_v11 = vmul.f32 0.00390625, %v95_v47  ;;  %v177_v40 = vsel %vm155_vm2, %v176_v26, %v172_v37  ;;  %v616_v26 = vld [vmem:[#allocation6 + $0x210] sm:$0xff] }
  0xc4   :  { %v100_v17 = vmul.f32 0.00390625, %v83_v49  ;;  %v156_v42 = vsel %vm155_vm2, %v154_v28, %v149_v39  ;;  %v986_v28 = vpack.c.bf16 %v616_v26, %v614_v25  ;;  %v558_v39 = vld [vmem:[#allocation6 + $0x48] sm:$0xff]  ;;  %v632_v26 = vld [vmem:[#allocation6 + $0x290] sm:$0xff] }
  0xc5   :  { %v181_v29 = vrot.slane %v104_v11, %v160_v10 }
  0xc6   :  { %v110_v53 = vpop.xlane.xlu1 %109  ;;  %v161_v33 = vrot.slane %v100_v17, %v160_v10  ;;  %v615_v17 = vld [vmem:[#allocation6 + $0x208] sm:$0xff] }
  0xc7   :  { %v107_v55 = vpop.xlane.xlu0 %106  ;;  %v201_v34 = vrot.slane %v110_v53, %v146_v57  ;;  %v182_v43 = vsel %vm162_vm3, %v181_v29, %v177_v40  ;;  %v984_v24 = vpack.c.bf16 %v617_v22, %v615_v17  ;;  %v556_v29 = vld [vmem:[#allocation6 + $0x38] sm:$0xff]  ;;  %v565_v22 = vld [vmem:[#allocation6 + $0x80] sm:$0xff] }
  0xc8   :  { %v197_v35 = vrot.slane %v107_v55, %v141_v56  ;;  %v163_v47 = vsel %vm162_vm3, %v161_v33, %v156_v42  ;;  %v560_v40 = vld [vmem:[#allocation6 + $0x58] sm:$0xff] }
  0xc9   :  { %v184_v55 = vsel %vm183_vm4, %v182_v43, %v163_v47  ;;  %985 = vmatprep.subr.bf16.mxu0 %v984_v24  ;;  %v1056_v42 = vpack.c.bf16 %v560_v40, %v558_v39  ;;  %v557_v43 = vld [vmem:[#allocation6 + $0x40] sm:$0xff]  ;;  %v574_v39 = vld [vmem:[#allocation6 + $0xc8] sm:$0xff]  ;;  %v576_v40 = vld [vmem:[#allocation6 + $0xd8] sm:$0xff] }
  0xca   :  { %v122_v3 = vpop.xlane.xlu1 %121  ;;  %v202_v48 = vsel %vm148_vm1, %v201_v34, %v197_v35  ;;  %v619_v34 = vld [vmem:[#allocation6 + $0x228] sm:$0xff]  ;;  %v621_v35 = vld [vmem:[#allocation6 + $0x238] sm:$0xff]  ;;  %v622_v47 = vld [vmem:[#allocation6 + $0x240] sm:$0xff] }
  0xcb   :  { %v119_v16 = vpop.xlane.xlu0 %118  ;;  %v220_v30 = vrot.slane %v122_v3, %v146_v57  ;;  %v550_v3 = vld [vmem:[#allocation6 + $0x8] sm:$0xff]  ;;  %v988_v37 = vpack.c.bf16 %v621_v35, %v619_v34  ;;  %v630_v24 = vld [vmem:[#allocation6 + $0x280] sm:$0xff]  ;;  %v571_v35 = vld [vmem:[#allocation6 + $0xb0] sm:$0xff] }
  0xcc   :  { %v216_v31 = vrot.slane %v119_v16, %v141_v56  ;;  %v1048_v11 = vpack.c.bf16 %v552_v7, %v550_v3  ;;  %v551_v16 = vld [vmem:[#allocation6 + $0x10] sm:$0xff]  ;;  %v568_v3 = vld [vmem:[#allocation6 + $0x98] sm:$0xff]  ;;  %v569_v34 = vld [vmem:[#allocation6 + $0xa0] sm:$0xff] }
  0xce   :  { %v125_v27 = vpop.xlane.xlu1 %124  ;;  %v221_v44 = vsel %vm148_vm1, %v220_v30, %v216_v31  ;;  %1049 = vmatprep.subr.bf16.mxu1 %v1048_v11  ;;  %v553_v30 = vld [vmem:[#allocation6 + $0x20] sm:$0xff]  ;;  %v555_v31 = vld [vmem:[#allocation6 + $0x30] sm:$0xff]  ;;  %v633_v11 = vld [vmem:[#allocation6 + $0x298] sm:$0xff] }
  0xcf   :  { %v113_v32 = vpop.xlane.xlu0 %112  ;;  %v225_v36 = vrot.slane %v125_v27, %v153_v59  ;;  %v554_v27 = vld [vmem:[#allocation6 + $0x28] sm:$0xff]  ;;  %v1054_v33 = vpack.c.bf16 %v555_v31, %v553_v30  ;;  %v637_v30 = vld [vmem:[#allocation6 + $0x2b8] sm:$0xff] }
  0xd0   :  { %v206_v38 = vrot.slane %v113_v32, %v153_v59  ;;  %v947_v59 = vld [vmem:[%s1530_s2] ss:$0 sm:$0xff]  ;;  %v1052_v32 = vpack.c.bf16 %v556_v29, %v554_v27  ;;  %v570_v27 = vld [vmem:[#allocation6 + $0xa8] sm:$0xff] }
  0xd1   :  { %v226_v49 = vsel %vm155_vm2, %v225_v36, %v221_v44  ;;  %v618_v36 = vld [vmem:[#allocation6 + $0x220] sm:$0xff]  ;;  %v559_v44 = vld [vmem:[#allocation6 + $0x50] sm:$0xff]  ;;  %v635_v29 = vld [vmem:[#allocation6 + $0x2a8] sm:$0xff] }
  0xd2   :  { %v128_v41 = vpop.xlane.xlu1 %127  ;;  %v207_v52 = vsel %vm155_vm2, %v206_v38, %v202_v48  ;;  %v620_v38 = vld [vmem:[#allocation6 + $0x230] sm:$0xff] }
  0xd3   :  { %v230_v45 = vrot.slane %v128_v41, %v160_v10  ;;  %v116_v46 = vpop.xlane.xlu0 %115  ;;  %v990_v41 = vpack.c.bf16 %v620_v38, %v618_v36  ;;  %v624_v48 = vld [vmem:[#allocation6 + $0x250] sm:$0xff]  ;;  %v634_v36 = vld [vmem:[#allocation6 + $0x2a0] sm:$0xff] }
  0xd4   :  { %v211_v51 = vrot.slane %v116_v46, %v160_v10  ;;  %v549_v10 = vld [vmem:[#allocation6] sm:$0xff]  ;;  %v625_v46 = vld [vmem:[#allocation6 + $0x258] sm:$0xff]  ;;  %v636_v38 = vld [vmem:[#allocation6 + $0x2b0] sm:$0xff] }
  0xd5   :  { %v231_v53 = vsel %vm162_vm3, %v230_v45, %v226_v49  ;;  %v1050_v23 = vpack.c.bf16 %v551_v16, %v549_v10  ;;  %v623_v45 = vld [vmem:[#allocation6 + $0x248] sm:$0xff]  ;;  %v1058_v49 = vpack.c.bf16 %v559_v44, %v557_v43  ;;  %v1070_v43 = vpack.c.bf16 %v571_v35, %v569_v34  ;;  %v649_v34 = vld [vmem:[#allocation6 + $0x318] sm:$0xff] }
  0xd6   :  { %v212_v54 = vsel %vm162_vm3, %v211_v51, %v207_v52  ;;  %v992_v51 = vpack.c.bf16 %v625_v46, %v623_v45  ;;  %v562_v52 = vld [vmem:[#allocation6 + $0x68] sm:$0xff]  ;;  %v1006_v44 = vpack.c.bf16 %v636_v38, %v634_v36  ;;  %v1072_v45 = vpack.c.bf16 %v576_v40, %v574_v39  ;;  %v573_v46 = vld [vmem:[#allocation6 + $0xc0] sm:$0xff]  ;;  %v588_v40 = vld [vmem:[#allocation6 + $0x138] sm:$0xff] }
  0xd7   :  { %v233_v56 = vsel %vm232_vm5, %v231_v53, %v212_v54  ;;  %v564_v53 = vld [vmem:[#allocation6 + $0x78] sm:$0xff]  ;;  %v561_v54 = vld [vmem:[#allocation6 + $0x60] sm:$0xff]  ;;  %v631_v10 = vld [vmem:[#allocation6 + $0x288] sm:$0xff] }
  0xd8   :  { %v236_v57 = vsel %vm235_vm6, %v184_v55, %v233_v56  ;;  %v994_v55 = vpack.c.bf16 %v624_v48, %v622_v47  ;;  %v1060_v56 = vpack.c.bf16 %v564_v53, %v562_v52  ;;  %v1000_v25 = vpack.c.bf16 %v633_v11, %v631_v10  ;;  %v575_v47 = vld [vmem:[#allocation6 + $0xd0] sm:$0xff]  ;;  %v638_v48 = vld [vmem:[#allocation6 + $0x2c0] sm:$0xff]  ;;  %v578_v52 = vld [vmem:[#allocation6 + $0xe8] sm:$0xff] }
  0xd9   :  { %971 = vmatmul.mubr.msk.f32.vlgmr.msra.gmra.mrb[0].mxu0 %vm248_vm7, %v236_v57  ;;  %v563_v57 = vld [vmem:[#allocation6 + $0x70] sm:$0xff]  ;;  %v580_v53 = vld [vmem:[#allocation6 + $0xf8] sm:$0xff]  ;;  %v646_v36 = vld [vmem:[#allocation6 + $0x300] sm:$0xff] }
  0xda   :  { %987 = vmatpush1.bf16.msra.mxu0 %v986_v28  ;;  %v1062_v7 = vpack.c.bf16 %v563_v57, %v561_v54  ;;  %v572_v28 = vld [vmem:[#allocation6 + $0xb8] sm:$0xff]  ;;  %v1074_v54 = vpack.c.bf16 %v575_v47, %v573_v46  ;;  %v577_v57 = vld [vmem:[#allocation6 + $0xe0] sm:$0xff]  ;;  %v586_v39 = vld [vmem:[#allocation6 + $0x128] sm:$0xff]  ;;  %v1392_v47 = vsub.s32 0, %v1362_v50 }
  0xdb   :  { %989 = vmatprep.subr.bf16.mxu0 %v988_v37  ;;  %v1004_v37 = vpack.c.bf16 %v637_v30, %v635_v29  ;;  %v581_v30 = vld [vmem:[#allocation6 + $0x100] sm:$0xff]  ;;  %v653_v46 = vld [vmem:[#allocation6 + $0x338] sm:$0xff] }
  0xde   :  { %991 = vmatpush1.bf16.msra.mxu0 %v990_v41  ;;  %v639_v41 = vld [vmem:[#allocation6 + $0x2c8] sm:$0xff] }
  0xdf   :  { %993 = vmatprep.subr.bf16.mxu0 %v992_v51  ;;  %v640_v51 = vld [vmem:[#allocation6 + $0x2d0] sm:$0xff] }
  0xe2   :  { %995 = vmatpush1.bf16.msra.mxu0 %v994_v55  ;;  %v1010_v55 = vpack.c.bf16 %v640_v51, %v638_v48  ;;  %v652_v51 = vld [vmem:[#allocation6 + $0x330] sm:$0xff] }
 0x1ac   :  { %v318_v60 = vpop.f32.mrb[0].mxu0 }
 0x1ad   :  { %v319_v61 = vadd.f32 %v947_v59, %v318_v60  ;;  %v972_v62 = vpop.f32.mrb[1].mxu0  ;;  %v629_v59 = vld [vmem:[#allocation6 + $0x278] sm:$0xff] }
 0x1ae   :  { %v996_v60 = vpack.c.bf16 %v629_v59, %v627_v58  ;;  %v628_v62 = vld [vmem:[#allocation6 + $0x270] sm:$0xff] }
 0x1af   :  { %v322_v63 = vmax.f32 %v319_v61, 0.0  ;;  %v626_v61 = vld [vmem:[#allocation6 + $0x260] sm:$0xff]  ;;  %v579_v58 = vld [vmem:[#allocation6 + $0xf0] sm:$0xff] }
 0x1b0   :  { %v998_v16 = vpack.c.bf16 %v628_v62, %v626_v61  ;;  %997 = vmatprep.subr.bf16.mxu0 %v996_v60  ;;  %v1078_v59 = vpack.c.bf16 %v579_v58, %v577_v57  ;;  %v949_v60 = vld [vmem:[%s1532_s4] ss:$0 sm:$0xff]  ;;  %v591_v57 = vld [vmem:[#allocation6 + $0x150] sm:$0xff] }
 0x1b1   :  { %976 = vmatmul.mubr.msk.f32.vlgmr.msra.gmra.mrb[0].mxu1 %vm331_vm8, %v322_v63  ;;  %v566_v63 = vld [vmem:[#allocation6 + $0x88] sm:$0xff] }
 0x1b2   :  { %1051 = vmatpush1.bf16.msra.mxu1 %v1050_v23  ;;  %v1064_v17 = vpack.c.bf16 %v568_v3, %v566_v63  ;;  %v567_v23 = vld [vmem:[#allocation6 + $0x90] sm:$0xff]  ;;  %999 = vmatpush1.bf16.msra.mxu0 %v998_v16  ;;  %v643_v16 = vld [vmem:[#allocation6 + $0x2e8] sm:$0xff] }
 0x1b3   :  { %1053 = vmatprep.subr.bf16.mxu1 %v1052_v32  ;;  %v1066_v31 = vpack.c.bf16 %v567_v23, %v565_v22  ;;  %v1002_v32 = vpack.c.bf16 %v632_v26, %v630_v24  ;;  %1001 = vmatprep.subr.bf16.mxu0 %v1000_v25  ;;  %v642_v24 = vld [vmem:[#allocation6 + $0x2e0] sm:$0xff]  ;;  %v644_v25 = vld [vmem:[#allocation6 + $0x2f0] sm:$0xff] }
 0x1b4   :  { %v1014_v26 = vpack.c.bf16 %v644_v25, %v642_v24  ;;  %v595_v24 = vld [vmem:[#allocation6 + $0x170] sm:$0xff] }
 0x1b6   :  { %1055 = vmatpush1.bf16.msra.mxu1 %v1054_v33  ;;  %v1068_v33 = vpack.c.bf16 %v572_v28, %v570_v27  ;;  %1003 = vmatpush1.bf16.msra.mxu0 %v1002_v32  ;;  %v582_v27 = vld [vmem:[#allocation6 + $0x108] sm:$0xff]  ;;  %v584_v28 = vld [vmem:[#allocation6 + $0x118] sm:$0xff] }
 0x1b7   :  { %1057 = vmatprep.subr.bf16.mxu1 %v1056_v42  ;;  %v641_v42 = vld [vmem:[#allocation6 + $0x2d8] sm:$0xff]  ;;  %1005 = vmatprep.subr.bf16.mxu0 %v1004_v37  ;;  %v1080_v29 = vpack.c.bf16 %v584_v28, %v582_v27  ;;  %v648_v37 = vld [vmem:[#allocation6 + $0x310] sm:$0xff] }
 0x1b8   :  { %v1018_v38 = vpack.c.bf16 %v648_v37, %v646_v36  ;;  %v661_v27 = vld [vmem:[#allocation6 + $0x378] sm:$0xff]  ;;  %v597_v36 = vld [vmem:[#allocation6 + $0x180] sm:$0xff]  ;;  %v599_v37 = vld [vmem:[#allocation6 + $0x190] sm:$0xff] }
 0x1ba   :  { %1059 = vmatpush1.bf16.msra.mxu1 %v1058_v49  ;;  %v1008_v49 = vpack.c.bf16 %v641_v42, %v639_v41  ;;  %1007 = vmatpush1.bf16.msra.mxu0 %v1006_v44  ;;  %v1084_v41 = vpack.c.bf16 %v588_v40, %v586_v39  ;;  %v585_v42 = vld [vmem:[#allocation6 + $0x120] sm:$0xff]  ;;  %v663_v39 = vld [vmem:[#allocation6 + $0x388] sm:$0xff]  ;;  %v665_v40 = vld [vmem:[#allocation6 + $0x398] sm:$0xff] }
 0x1bb   :  { %1061 = vmatprep.subr.bf16.mxu1 %v1060_v56  ;;  %v1076_v56 = vpack.c.bf16 %v580_v53, %v578_v52  ;;  %v590_v53 = vld [vmem:[#allocation6 + $0x148] sm:$0xff] }
 0x1bc   :  { %1009 = vmatprep.subr.bf16.mxu0 %v1008_v49  ;;  %v650_v49 = vld [vmem:[#allocation6 + $0x320] sm:$0xff] }
 0x1bd   :  { %v1022_v52 = vpack.c.bf16 %v652_v51, %v650_v49  ;;  %v601_v49 = vld [vmem:[#allocation6 + $0x1a0] sm:$0xff]  ;;  %v603_v51 = vld [vmem:[#allocation6 + $0x1b0] sm:$0xff] }
 0x1be   :  { %1063 = vmatpush1.bf16.msra.mxu1 %v1062_v7  ;;  %1011 = vmatpush1.bf16.msra.mxu0 %v1010_v55 }
 0x1bf   :  { %1065 = vmatprep.subr.bf16.mxu1 %v1064_v17  ;;  %v645_v17 = vld [vmem:[#allocation6 + $0x2f8] sm:$0xff] }
 0x1c0   :  { %v1012_v23 = vpack.c.bf16 %v645_v17, %v643_v16  ;;  %v594_v16 = vld [vmem:[#allocation6 + $0x168] sm:$0xff]  ;;  %v596_v17 = vld [vmem:[#allocation6 + $0x178] sm:$0xff] }
 0x1c2   :  { %1067 = vmatpush1.bf16.msra.mxu1 %v1066_v31  ;;  %1013 = vmatprep.subr.bf16.mxu0 %v1012_v23  ;;  %v583_v31 = vld [vmem:[#allocation6 + $0x110] sm:$0xff]  ;;  %v593_v23 = vld [vmem:[#allocation6 + $0x160] sm:$0xff] }
 0x1c3   :  { %1069 = vmatprep.subr.bf16.mxu1 %v1068_v33  ;;  %1015 = vmatpush1.bf16.msra.mxu0 %v1014_v26  ;;  %v1082_v32 = vpack.c.bf16 %v583_v31, %v581_v30  ;;  %v647_v33 = vld [vmem:[#allocation6 + $0x308] sm:$0xff]  ;;  %v1094_v25 = vpack.c.bf16 %v595_v24, %v593_v23  ;;  %v658_v30 = vld [vmem:[#allocation6 + $0x360] sm:$0xff]  ;;  %v660_v31 = vld [vmem:[#allocation6 + $0x370] sm:$0xff] }
 0x1c4   :  { %v1016_v35 = vpack.c.bf16 %v649_v34, %v647_v33  ;;  %v659_v26 = vld [vmem:[#allocation6 + $0x368] sm:$0xff]  ;;  %v600_v34 = vld [vmem:[#allocation6 + $0x198] sm:$0xff] }
 0x1c5   :  { %v598_v33 = vld [vmem:[#allocation6 + $0x188] sm:$0xff]  ;;  %v612_v24 = vld [vmem:[#allocation6 + $0x1f8] sm:$0xff] }
 0x1c6   :  { %1071 = vmatpush1.bf16.msra.mxu1 %v1070_v43  ;;  %1017 = vmatprep.subr.bf16.mxu0 %v1016_v35  ;;  %v587_v43 = vld [vmem:[#allocation6 + $0x130] sm:$0xff]  ;;  %v1096_v35 = vpack.c.bf16 %v600_v34, %v598_v33  ;;  %v610_v23 = vld [vmem:[#allocation6 + $0x1e8] sm:$0xff]  ;;  %v674_v33 = vld [vmem:[#allocation6 + $0x3e0] sm:$0xff] }
 0x1c7   :  { %1073 = vmatprep.subr.bf16.mxu1 %v1072_v45  ;;  %1019 = vmatpush1.bf16.msra.mxu0 %v1018_v38  ;;  %v1086_v44 = vpack.c.bf16 %v587_v43, %v585_v42  ;;  %v651_v45 = vld [vmem:[#allocation6 + $0x328] sm:$0xff]  ;;  %v1098_v38 = vpack.c.bf16 %v599_v37, %v597_v36  ;;  %v662_v42 = vld [vmem:[#allocation6 + $0x380] sm:$0xff]  ;;  %v664_v43 = vld [vmem:[#allocation6 + $0x390] sm:$0xff] }
 0x1c8   :  { %v1020_v48 = vpack.c.bf16 %v653_v46, %v651_v45  ;;  %v602_v45 = vld [vmem:[#allocation6 + $0x1a8] sm:$0xff]  ;;  %v604_v46 = vld [vmem:[#allocation6 + $0x1b8] sm:$0xff]  ;;  %v676_v34 = vld [vmem:[#allocation6 + $0x3f0] sm:$0xff] }
 0x1c9   :  { %v1046_v36 = vpack.c.bf16 %v676_v34, %v674_v33 }
 0x1ca   :  { %1075 = vmatpush1.bf16.msra.mxu1 %v1074_v54  ;;  %v592_v54 = vld [vmem:[#allocation6 + $0x158] sm:$0xff]  ;;  %1021 = vmatprep.subr.bf16.mxu0 %v1020_v48  ;;  %v1100_v48 = vpack.c.bf16 %v604_v46, %v602_v45 }
 0x1cb   :  { %1077 = vmatprep.subr.bf16.mxu1 %v1076_v56  ;;  %v1088_v55 = vpack.c.bf16 %v592_v54, %v590_v53  ;;  %v589_v56 = vld [vmem:[#allocation6 + $0x140] sm:$0xff]  ;;  %1023 = vmatpush1.bf16.msra.mxu0 %v1022_v52  ;;  %v1102_v52 = vpack.c.bf16 %v603_v51, %v601_v49  ;;  %v667_v53 = vld [vmem:[#allocation6 + $0x3a8] sm:$0xff]  ;;  %v669_v54 = vld [vmem:[#allocation6 + $0x3b8] sm:$0xff] }
 0x1ce   :  { %1079 = vmatpush1.bf16.msra.mxu1 %v1078_v59  ;;  %v1090_v59 = vpack.c.bf16 %v591_v57, %v589_v56  ;;  %v666_v56 = vld [vmem:[#allocation6 + $0x3a0] sm:$0xff]  ;;  %v668_v57 = vld [vmem:[#allocation6 + $0x3b0] sm:$0xff] }
 0x1cf   :  { %1081 = vmatprep.subr.bf16.mxu1 %v1080_v29  ;;  %v1028_v29 = vpack.c.bf16 %v661_v27, %v659_v26  ;;  %v1108_v26 = vpack.c.bf16 %v612_v24, %v610_v23  ;;  %v609_v27 = vld [vmem:[#allocation6 + $0x1e0] sm:$0xff] }
 0x1d2   :  { %1083 = vmatpush1.bf16.msra.mxu1 %v1082_v32  ;;  %v1030_v32 = vpack.c.bf16 %v660_v31, %v658_v30  ;;  %v675_v30 = vld [vmem:[#allocation6 + $0x3e8] sm:$0xff] }
 0x1d3   :  { %1085 = vmatprep.subr.bf16.mxu1 %v1084_v41  ;;  %v1032_v41 = vpack.c.bf16 %v665_v40, %v663_v39 }
 0x1d6   :  { %1087 = vmatpush1.bf16.msra.mxu1 %v1086_v44  ;;  %v1034_v44 = vpack.c.bf16 %v664_v43, %v662_v42 }
 0x1d7   :  { %1089 = vmatprep.subr.bf16.mxu1 %v1088_v55  ;;  %v1036_v55 = vpack.c.bf16 %v669_v54, %v667_v53 }
 0x1da   :  { %1091 = vmatpush1.bf16.msra.mxu1 %v1090_v59  ;;  %v606_v59 = vld [vmem:[#allocation6 + $0x1c8] sm:$0xff] }
 0x284   :  { %v404_v61 = vpop.f32.mrb[0].mxu1 }
 0x285   :  { %v405_v62 = vadd.f32 %v949_v60, %v404_v61  ;;  %v977_v63 = vpop.f32.mrb[1].mxu1  ;;  %v655_v60 = vld [vmem:[#allocation6 + $0x348] sm:$0xff]  ;;  %v657_v61 = vld [vmem:[#allocation6 + $0x358] sm:$0xff] }
 0x286   :  { %v1396_v63 = vsub.s32 1, %v1362_v50 }
 0x287   :  { %v409_v3 = vrot.slane %v405_v62, 2 }
 0x289   :  { %v411_v7 = vadd.f32 %v409_v3, %v405_v62  ;;  %v1024_v3 = vpack.c.bf16 %v657_v61, %v655_v60  ;;  %v608_v60 = vld [vmem:[#allocation6 + $0x1d8] sm:$0xff] }
 0x28a   :  { %v1104_v61 = vpack.c.bf16 %v608_v60, %v606_v59 }
 0x28b   :  { %v952_v10 = vmul.f32 -1.442695, %v411_v7  ;;  %v654_v7 = vld [vmem:[#allocation6 + $0x340] sm:$0xff]  ;;  %1025 = vmatprep.subr.bf16.mxu0 %v1024_v3  ;;  %v607_v3 = vld [vmem:[#allocation6 + $0x1d0] sm:$0xff] }
 0x28d   :  { %1123 = vpow2.f32 %v952_v10  ;;  %v656_v10 = vld [vmem:[#allocation6 + $0x350] sm:$0xff] }
 0x297   :  { %v1124_v11 = vpop.eup %1123 }
 0x298   :  { %v415_v22 = vadd.f32 1.0, %v1124_v11  ;;  %v1026_v11 = vpack.c.bf16 %v656_v10, %v654_v7  ;;  %v671_v10 = vld [vmem:[#allocation6 + $0x3c8] sm:$0xff] }
 0x29a   :  { %1125 = vrcp.f32 %v415_v22  ;;  %v1092_v22 = vpack.c.bf16 %v596_v17, %v594_v16  ;;  %1027 = vmatpush1.bf16.msra.mxu0 %v1026_v11  ;;  %v673_v11 = vld [vmem:[#allocation6 + $0x3d8] sm:$0xff]  ;;  %v670_v16 = vld [vmem:[#allocation6 + $0x3c0] sm:$0xff] }
 0x29b   :  { %1029 = vmatprep.subr.bf16.mxu0 %v1028_v29  ;;  %v1040_v17 = vpack.c.bf16 %v673_v11, %v671_v10  ;;  %v611_v29 = vld [vmem:[#allocation6 + $0x1f0] sm:$0xff] }
 0x29c   :  { %1093 = vmatprep.subr.bf16.mxu1 %v1092_v22  ;;  %v672_v22 = vld [vmem:[#allocation6 + $0x3d0] sm:$0xff]  ;;  %v1110_v31 = vpack.c.bf16 %v611_v29, %v609_v27 }
 0x29d   :  { %1095 = vmatpush1.bf16.msra.mxu1 %v1094_v25  ;;  %v1042_v25 = vpack.c.bf16 %v672_v22, %v670_v16 }
 0x29e   :  { %1031 = vmatpush1.bf16.msra.mxu0 %v1030_v32  ;;  %1097 = vmatprep.subr.bf16.mxu1 %v1096_v35  ;;  %v677_v32 = vld [vmem:[#allocation6 + $0x3f8] sm:$0xff] }
 0x29f   :  { %1033 = vmatprep.subr.bf16.mxu0 %v1032_v41  ;;  %v1044_v35 = vpack.c.bf16 %v677_v32, %v675_v30 }
 0x2a1   :  { %1099 = vmatpush1.bf16.msra.mxu1 %v1098_v38 }
 0x2a2   :  { %1035 = vmatpush1.bf16.msra.mxu0 %v1034_v44  ;;  %1101 = vmatprep.subr.bf16.mxu1 %v1100_v48 }
 0x2a3   :  { %1037 = vmatprep.subr.bf16.mxu0 %v1036_v55 }
 0x2a4   :  { %v1126_v58 = vpop.eup %1125 }
 0x2a5   :  { %v421_v62 = vrot.slane %v1126_v58, %v1392_v47  ;;  %v1399_v28 = vrot.slane %v1126_v58, %v1396_v63  ;;  %1103 = vmatpush1.bf16.msra.mxu1 %v1102_v52  ;;  %v1038_v58 = vpack.c.bf16 %v668_v57, %v666_v56 }
 0x2a6   :  { %1105 = vmatprep.subr.bf16.mxu1 %v1104_v61 }
 0x2a7   :  { %427 = vbcast.lane.b32.xlu1 %v421_v62, 264  ;;  %423 = vbcast.lane.b32.xlu0 %v421_v62, 256 }
 0x2a8   :  { %1039 = vmatpush1.bf16.msra.mxu0 %v1038_v58 }
 0x2a9   :  { %1041 = vmatprep.subr.bf16.mxu0 %v1040_v17 }
 0x2ab   :  { %442 = vbcast.lane.b32.xlu1 %v1399_v28, 256  ;;  %431 = vbcast.lane.b32.xlu0 %v421_v62, 272 }
 0x2ac   :  { %1043 = vmatpush1.bf16.msra.mxu0 %v1042_v25 }
 0x2ad   :  { %1045 = vmatprep.subr.bf16.mxu0 %v1044_v35 }
 0x2af   :  { %446 = vbcast.lane.b32.xlu1 %v1399_v28, 264  ;;  %435 = vbcast.lane.b32.xlu0 %v421_v62, 280  ;;  %v605_v62 = vld [vmem:[#allocation6 + $0x1c0] sm:$0xff] }
 0x2b0   :  { %v1106_v7 = vpack.c.bf16 %v607_v3, %v605_v62  ;;  %1047 = vmatpush1.bf16.msra.mxu0 %v1046_v36 }
 0x2b2   :  { %1107 = vmatpush1.bf16.msra.mxu1 %v1106_v7 }
 0x2b3   :  { %450 = vbcast.lane.b32.xlu1 %v1399_v28, 272  ;;  %1109 = vmatprep.subr.bf16.mxu1 %v1108_v26 }
 0x2b6   :  { %1111 = vmatpush1.bf16.msra.mxu1 %v1110_v31 }
 0x2b7   :  { %454 = vbcast.lane.b32.xlu1 %v1399_v28, 280 }
 0x319   :  { %v428_v37 = vpop.permute.xlu1 %427  ;;  %v424_v38 = vpop.permute.xlu0 %423 }
 0x31a   :  { %v1406_v39 = vmul.f32 %v428_v37, %v1302_v8  ;;  %v1409_v40 = vmul.f32 %v428_v37, %v1304_v9  ;;  %v1412_v28 = vmul.f32 %v424_v38, %v1290_v2  ;;  %v1415_v41 = vmul.f32 %v424_v38, %v1294_v4 }
 0x31c   :  { %v472_v8 = vmax.f32 %v1412_v28, %v1406_v39  ;;  %v481_v9 = vmax.f32 %v1415_v41, %v1409_v40  ;;  %v508_v2 = vadd.f32 %v1406_v39, %v1412_v28  ;;  %v517_v4 = vadd.f32 %v1409_v40, %v1415_v41 }
 0x31d   :  { %v443_v42 = vpop.permute.xlu1 %442  ;;  %v432_v43 = vpop.permute.xlu0 %431 }
 0x31e   :  { %v1418_v44 = vmul.f32 %v432_v43, %v1314_v14  ;;  %v1421_v45 = vmul.f32 %v432_v43, %v1316_v15 }
 0x320   :  { %v473_v52 = vmax.f32 %v472_v8, %v1418_v44  ;;  %v482_v53 = vmax.f32 %v481_v9, %v1421_v45  ;;  %v509_v54 = vadd.f32 %v508_v2, %v1418_v44  ;;  %v518_v55 = vadd.f32 %v517_v4, %v1421_v45 }
 0x321   :  { %v447_v46 = vpop.permute.xlu1 %446  ;;  %v436_v48 = vpop.permute.xlu0 %435 }
 0x322   :  { %v1432_v14 = vmul.f32 %v447_v46, %v1296_v5  ;;  %v1435_v15 = vmul.f32 %v447_v46, %v1298_v6  ;;  %v1438_v49 = vmul.f32 %v436_v48, %v1326_v20  ;;  %v1441_v51 = vmul.f32 %v436_v48, %v1328_v21 }
 0x323   :  { %v1448_v5 = vmul.f32 %v443_v42, %v1286_v0  ;;  %v1451_v6 = vmul.f32 %v443_v42, %v1288_v1 }
 0x324   :  { %v474_v20 = vmax.f32 %v473_v52, %v1438_v49  ;;  %v483_v56 = vmax.f32 %v482_v53, %v1441_v51  ;;  %v510_v21 = vadd.f32 %v509_v54, %v1438_v49  ;;  %v519_v57 = vadd.f32 %v518_v55, %v1441_v51 }
 0x325   :  { %v451_v58 = vpop.permute.xlu1 %450  ;;  %v490_v59 = vmax.f32 %v1448_v5, %v1432_v14  ;;  %v499_v60 = vmax.f32 %v1451_v6, %v1435_v15  ;;  %v526_v10 = vadd.f32 %v1432_v14, %v1448_v5  ;;  %v535_v11 = vadd.f32 %v1435_v15, %v1451_v6 }
 0x326   :  { %v1462_v0 = vmul.f32 %v451_v58, %v1310_v12  ;;  %v1465_v1 = vmul.f32 %v451_v58, %v1312_v13  ;;  %v475_v61 = vrot.slane %v474_v20, 4  ;;  %v484_v62 = vrot.slane %v483_v56, 4 }
 0x327   :  { %v511_v3 = vrot.slane %v510_v21, 4  ;;  %v520_v7 = vrot.slane %v519_v57, 4 }
 0x328   :  { %v491_v16 = vmax.f32 %v490_v59, %v1462_v0  ;;  %v500_v17 = vmax.f32 %v499_v60, %v1465_v1  ;;  %v476_v22 = vmax.f32 %v474_v20, %v475_v61  ;;  %v485_v12 = vmax.f32 %v483_v56, %v484_v62 }
 0x329   :  { %v512_v23 = vadd.f32 %v511_v3, %v510_v21  ;;  %v521_v24 = vadd.f32 %v520_v7, %v519_v57  ;;  %v455_v13 = vpop.permute.xlu1 %454  ;;  %v527_v25 = vadd.f32 %v526_v10, %v1462_v0  ;;  %v536_v26 = vadd.f32 %v535_v11, %v1465_v1 }
 0x32a   :  { %v1476_v27 = vmul.f32 %v455_v13, %v1322_v18  ;;  %v1479_v29 = vmul.f32 %v455_v13, %v1324_v19  ;;  %v477_v30 = vrot.slane %v476_v22, 2  ;;  %v486_v31 = vrot.slane %v485_v12, 2 }
 0x32b   :  { %v513_v32 = vrot.slane %v512_v23, 2  ;;  %v522_v33 = vrot.slane %v521_v24, 2 }
 0x32c   :  { %v492_v34 = vmax.f32 %v491_v16, %v1476_v27  ;;  %v501_v35 = vmax.f32 %v500_v17, %v1479_v29  ;;  %v528_v36 = vadd.f32 %v527_v25, %v1476_v27  ;;  %v537_v37 = vadd.f32 %v536_v26, %v1479_v29 }
 0x32d   :  { %v514_v38 = vadd.f32 %v513_v32, %v512_v23  ;;  %v523_v42 = vadd.f32 %v522_v33, %v521_v24  ;;  %v478_v19 = vmax.f32 %v476_v22, %v477_v30  ;;  %v487_v2 = vmax.f32 %v485_v12, %v486_v31 }
 0x32e   :  { %v493_v43 = vrot.slane %v492_v34, 4  ;;  %v502_v18 = vrot.slane %v501_v35, 4  ;;  %v529_v8 = vrot.slane %v528_v36, 4  ;;  %v538_v9 = vrot.slane %v537_v37, 4 }
 0x32f   :  { %v524_v53 = vrot.slane %v523_v42, 1  ;;  %v515_v54 = vrot.slane %v514_v38, 1  ;;  %v488_v57 = vrot.slane %v487_v2, 1  ;;  %v479_v58 = vrot.slane %v478_v19, 1 }
 0x330   :  { %v494_v4 = vmax.f32 %v492_v34, %v493_v43  ;;  %v503_v46 = vmax.f32 %v501_v35, %v502_v18  ;;  %v530_v48 = vadd.f32 %v529_v8, %v528_v36  ;;  %v539_v52 = vadd.f32 %v538_v9, %v537_v37 }
 0x331   :  { %v525_v3 = vadd.f32 %v524_v53, %v523_v42  ;;  %v516_v7 = vadd.f32 %v515_v54, %v514_v38  ;;  %v489_v22 = vmax.f32 %v487_v2, %v488_v57  ;;  %v480_v12 = vmax.f32 %v478_v19, %v479_v58 }
 0x332   :  { %v495_v55 = vrot.slane %v494_v4, 2  ;;  %v504_v20 = vrot.slane %v503_v46, 2  ;;  %v531_v56 = vrot.slane %v530_v48, 2  ;;  %v540_v21 = vrot.slane %v539_v52, 2 }
 0x333   :  { %v546_v26 = vmul.f32 0.03125, %v525_v3  ;;  %v545_v30 = vmul.f32 0.03125, %v516_v7  ;;  %v837_v43 = vstv %s1534_s6  ;;  %s1215_s6 = smov [#allocation8]  }
 0x334   :  { %v496_v59 = vmax.f32 %v494_v4, %v495_v55  ;;  %v532_v60 = vadd.f32 %v531_v56, %v530_v48  ;;  %v505_v61 = vmax.f32 %v503_v46, %v504_v20  ;;  %v541_v62 = vadd.f32 %v540_v21, %v539_v52  ;;  %s934_s16 = sshll.u32 %s1215_s6, 4  ;;  %s935_s16 = int_to_ptr.vmem [resolvable:$true] %s934_s16 }
 0x335   :  { %v1214_v55 = vmov 1966171168   ;;  %s1179_s17 = scalar_lea.vmem %s935_s16, 2048  ;;  %p1184_p3 = scmp.lt.s32.totalorder %s935_s16, %s935_s16 }
 0x336   :  { %v506_v10 = vrot.slane %v505_v61, 1  ;;  %v497_v11 = vrot.slane %v496_v59, 1  ;;  %v542_v16 = vrot.slane %v541_v62, 1  ;;  %v533_v17 = vrot.slane %v532_v60, 1  ;;  %p1180_p2 = scmp.ne.s32.totalorder %s935_s16, %s1179_s17  ;;  %p1185_p4 = scmp.lt.s32.totalorder %s1179_s17, %s1179_s17 }
 0x337   :  { %v856_v20 = vunpack.c.l.s4 %v1214_v55 }
 0x338   :  { %v507_v23 = vmax.f32 %v505_v61, %v506_v10  ;;  %v498_v24 = vmax.f32 %v496_v59, %v497_v11  ;;  %v543_v13 = vadd.f32 %v542_v16, %v541_v62  ;;  %v534_v25 = vadd.f32 %v533_v17, %v532_v60  ;;  %p1186_p5 = por %p1185_p4, %p1184_p3 }
 0x339   :  { %v857_v56 = vunpack.c.0.s8 %v856_v20 }
 0x33a   :  { %v762_v31 = vsel %vm183_vm4, %v507_v23, %v489_v22  ;;  %v761_v32 = vsel %vm183_vm4, %v498_v24, %v480_v12  ;;  %v548_v33 = vmul.f32 0.03125, %v543_v13  ;;  %v547_v34 = vmul.f32 0.03125, %v534_v25  ;;  %p1187_p6 = pnand %p1186_p5, %p1180_p2 }
 0x33b   :  { %829 = vmatprep.mubr.f32.mxu1 %v762_v31  ;;  %v860_v57 = vsub.s32 %v857_v56, %v1362_v50 }
 0x33c   :  { %830 = vmatmul.mubr.f32.vlgmr.msra.gmra.mrb[2].mxu1 %v761_v32  ;;  %v683_v35 = vsel %vm183_vm4, %v548_v33, %v546_v26  ;;  %v682_v36 = vsel %vm183_vm4, %v547_v34, %v545_v30 }
 0x33d   :  { %750 = vmatprep.mubr.f32.mxu0 %v683_v35 }
 0x33e   :  { %751 = vmatmul.mubr.f32.vlgmr.msra.gmra.mrb[2].mxu0 %v682_v36 }
 0x40f   :  { %v831_v37 = vpop.f32.mrb[2].mxu1 }
 0x410   :  { %v833_v38 = vpop.f32.mrb[3].mxu1 }
 0x411   :  { %v752_v42 = vpop.f32.mrb[2].mxu0 }
 0x412   :  { %v832_v18 = vadd.f32 %v831_v37, %v752_v42  ;;  %v754_v8 = vpop.f32.mrb[3].mxu0 }
 0x413   :  { %v834_v9 = vadd.f32 %v833_v38, %v754_v8 }
 0x414   :  { %v838_v19 = vadd.f32 %v837_v43, %v832_v18 }
 0x415   :  { %v839_v2 = vadd.f32 %v837_v43, %v834_v9 }
 0x416   :  { %v953_v4 = vmul.f32 -1.442695, %v838_v19 }
 0x417   :  { %v954_v46 = vmul.f32 -1.442695, %v839_v2 }
 0x418   :  { %1127 = vpow2.f32 %v953_v4 }
 0x419   :  { %1129 = vpow2.f32 %v954_v46 }
 0x422   :  { %v1128_v48 = vpop.eup %1127 }
 0x423   :  { %v1130_v52 = vpop.eup %1129  ;;  %v846_v53 = vadd.f32 1.0, %v1128_v48 }
 0x424   :  { %v847_v54 = vadd.f32 1.0, %v1130_v52 }
 0x425   :  { %1131 = vrcp.f32 %v846_v53 }
 0x426   :  { %1133 = vrcp.f32 %v847_v54 }
 0x42f   :  { %v1132_v21 = vpop.eup %1131 }
 0x430   :  { %v1134_v58 = vpop.eup %1133 }
 0x431   :  { %v854_v59 = vcombine.low %v1132_v21, %v1134_v58 }
 0x433   :  { %v861_v60 = vrot.slane %v854_v59, %v860_v57 }
 0x435   :  { %v862_v61 = vcombine.high %v861_v60, %v861_v60  ;;  %v869_v62 = vrot.slane %v861_v60, %v860_v57 }
 0x437   :  { %v876_v3 = vrot.slane %v862_v61, %v860_v57  ;;  %v880_v7 = vrot.slane %v869_v62, %v1392_v47  ;;  %v884_v10 = vrot.slane %v869_v62, %v1396_v63 }
 0x439   :  { %v888_v11 = vrot.slane %v876_v3, %v1392_v47  ;;  %v892_v16 = vrot.slane %v876_v3, %v1396_v63  ;;  %v897_v17 = vmul.f32 %v880_v7, %v1412_v28  ;;  %v898_v22 = vmul.f32 %v884_v10, %v1415_v41 }
 0x43a   :  { %v899_v50 = vmul.f32 %v880_v7, %v1406_v39  ;;  %v900_v12 = vmul.f32 %v884_v10, %v1409_v40  ;;  %v901_v23 = vmul.f32 %v880_v7, %v1418_v44  ;;  %v902_v24 = vmul.f32 %v884_v10, %v1421_v45 }
 0x43b   :  { %v903_v13 = vmul.f32 %v880_v7, %v1438_v49  ;;  %v904_v47 = vmul.f32 %v884_v10, %v1441_v51  ;;  %v905_v63 = vmul.f32 %v888_v11, %v1448_v5  ;;  %v906_v28 = vmul.f32 %v892_v16, %v1451_v6  ;;  %913 = vst [vmem:[#allocation8] sm:$0xff] %v897_v17 }
 0x43c   :  { %914 = vst [vmem:[#allocation8 + $0x8] sm:$0xff] %v898_v22  ;;  %v907_v39 = vmul.f32 %v888_v11, %v1432_v14  ;;  %v908_v40 = vmul.f32 %v892_v16, %v1435_v15  ;;  %v909_v41 = vmul.f32 %v888_v11, %v1462_v0  ;;  %v910_v44 = vmul.f32 %v892_v16, %v1465_v1 }
 0x43d   :  { %915 = vst [vmem:[#allocation8 + $0x10] sm:$0xff] %v899_v50  ;;  %916 = vst [vmem:[#allocation8 + $0x18] sm:$0xff] %v900_v12  ;;  %v911_v45 = vmul.f32 %v888_v11, %v1476_v27  ;;  %v912_v49 = vmul.f32 %v892_v16, %v1479_v29 }
 0x43e   :  { %917 = vst [vmem:[#allocation8 + $0x20] sm:$0xff] %v901_v23  ;;  %918 = vst [vmem:[#allocation8 + $0x28] sm:$0xff] %v902_v24 }
 0x43f   :  { %919 = vst [vmem:[#allocation8 + $0x30] sm:$0xff] %v903_v13  ;;  %920 = vst [vmem:[#allocation8 + $0x38] sm:$0xff] %v904_v47 }
 0x440   :  { %921 = vst [vmem:[#allocation8 + $0x40] sm:$0xff] %v905_v63  ;;  %922 = vst [vmem:[#allocation8 + $0x48] sm:$0xff] %v906_v28 }
 0x441   :  { %923 = vst [vmem:[#allocation8 + $0x50] sm:$0xff] %v907_v39  ;;  %924 = vst [vmem:[#allocation8 + $0x58] sm:$0xff] %v908_v40 }
 0x442   :  { %925 = vst [vmem:[#allocation8 + $0x60] sm:$0xff] %v909_v41  ;;  %926 = vst [vmem:[#allocation8 + $0x68] sm:$0xff] %v910_v44 }
 0x443   :  { %927 = vst [vmem:[#allocation8 + $0x70] sm:$0xff] %v911_v45  ;;  %928 = vst [vmem:[#allocation8 + $0x78] sm:$0xff] %v912_v49 }
 0x444   :  { %1190 = shalt.err (!%p1187_p6)
}
 0x445   :  { %s1191_s20 = scalar_lea.hbm %s1535_s7, 2048 }
 0x446   :  { %p1192_p7 = scmp.ne.s32.totalorder %s1535_s7, %s1191_s20  ;;  %p1195_p8 = scmp.lt.u32.totalorder %s1191_s20, %s1535_s7 }
 0x448   :  { %p1197_p9 = pnand %p1195_p8, %p1192_p7 }
 0x44a   :  { %1200 = shalt.err (!%p1197_p9)
}
 0x44b   :  { %940 = dma.vmem_to_hbm [thread:$0]  %s935_s16, 2048, %s1535_s7, [#allocation5], %s1208_s11, %s1208_s11, %s1209_s12  }
 0x44c   :  { %1205 = dma.done.wait [#allocation5], 2048  }
 0x44d   :  { %1206 = vsyncadd [#allocation5], 4294965248 }
 0x44e   :  { %944 = vsyncpa [#allocation4], 1 }
 0x44f   :  { %945 = vsyncpa [#allocation7], 1 }
 0x450   :  { %946 = vsyncpa [#allocation5], 1 }

</bundles_post_ra>
